<compile_context>
chip_gen: v5e
topology: v5e:2x2
jax: 0.10.0
libtpu: 0.0.40
codegen_flags: <defaults>
</compile_context>

<pallas_src>
import jax
import jax.numpy as jnp
from jax.experimental import pallas as pl
from jax.experimental.pallas import tpu as pltpu


def mlp_kernel(x_ref, w_ref, b2_ref, o_ref):
    x = x_ref[...]            # (1, tb)    batch on lanes
    w1 = w_ref[0]             # (Hp, tb)   pre-replicated across lanes
    b1 = w_ref[1]             # (Hp, tb)
    w2 = w_ref[2]             # (Hp, tb)
    b2 = b2_ref[0]            # scalar from SMEM

    # fc1 + ReLU: pure VPU elementwise (x sublane-broadcast once per step)
    h = jnp.maximum(w1 * x + b1, 0.0)          # (Hp, tb)
    # fc2: sublane (XLU) reduction over hidden, then scalar bias add
    y = jnp.sum(h * w2, axis=0, keepdims=True) + b2   # (1, tb)
    # sigmoid on EUP (kept exact to satisfy 1e-5 tolerance)
    o_ref[...] = jax.nn.sigmoid(y).astype(o_ref.dtype)


def mlp_forward(x, w1, b1, w2, b2):
    """x: (N, 1) f32.  w1,b1,w2: (H, 1) f32.  b2: (1,) f32.  Returns (N, 1) f32."""
    N = x.shape[0]
    H = w1.shape[0]
    Hp = ((H + 7) // 8) * 8                     # 50 -> 56, sublane aligned

    # Block width: lane-dense, capped at 512 so the (Hp, tb) intermediate fits
    # comfortably in the 64-vreg file (no spills). Large N automatically gets
    # >=2 parallel grid blocks (megacore on v7x); small N uses a single block.
    tb = min(512, ((N + 127) // 128) * 128)
    Np = ((N + tb - 1) // tb) * tb
    grid = (Np // tb,)

    # Batch on lanes; pad only when N is not already a multiple of tb.
    x_lane = x.reshape(1, N)
    if Np != N:
        x_lane = jnp.pad(x_lane, ((0, 0), (0, Np - N)))

    # Pack w1/b1/w2 into one array, zero-padded to Hp rows (zero rows of b1 and
    # w2 contribute nothing), replicated across the tb lanes once here so the
    # kernel never re-broadcasts per grid step.
    w_cols = jnp.zeros((3, Hp, 1), jnp.float32)
    w_cols = w_cols.at[0, :H].set(w1)
    w_cols = w_cols.at[1, :H].set(b1)
    w_cols = w_cols.at[2, :H].set(w2)
    w_packed = jnp.broadcast_to(w_cols, (3, Hp, tb))

    y_lane = pl.pallas_call(
        mlp_kernel,
        out_shape=jax.ShapeDtypeStruct((1, Np), jnp.float32),
        grid_spec=pltpu.PrefetchScalarGridSpec(
            num_scalar_prefetch=0,
            grid=grid,
            in_specs=[
                pl.BlockSpec((1, tb), lambda i: (0, i)),          # x tile (lanes)
                pl.BlockSpec((3, Hp, tb), lambda i: (0, 0, 0)),   # packed weights (constant)
                pl.BlockSpec(memory_space=pltpu.MemorySpace.SMEM),  # b2 scalar
            ],
            out_specs=pl.BlockSpec((1, tb), lambda i: (0, i)),
        ),
        compiler_params=pltpu.CompilerParams(
            dimension_semantics=("parallel",),
        ),
    )(x_lane, w_packed, b2)

    return y_lane[:, :N].reshape(N, 1)


def init_params(key, in_dim=1, hidden=50, out_dim=1):
    # Mimic PyTorch nn.Linear default init: U(-1/sqrt(fan_in), 1/sqrt(fan_in)).
    # Stored layouts: w1,b1,w2 as (hidden, 1); b2 as (1,).
    k1, k2, k3, k4 = jax.random.split(key, 4)
    bound1 = 1.0 / jnp.sqrt(float(in_dim))
    bound2 = 1.0 / jnp.sqrt(float(hidden))
    w1 = jax.random.uniform(k1, (hidden, in_dim), jnp.float32, -bound1, bound1)   # = fc1.weight
    b1 = jax.random.uniform(k2, (hidden, 1), jnp.float32, -bound1, bound1)        # fc1.bias (col)
    w2 = jax.random.uniform(k3, (hidden, out_dim), jnp.float32, -bound2, bound2)  # = fc2.weight^T
    b2 = jax.random.uniform(k4, (out_dim,), jnp.float32, -bound2, bound2)         # fc2.bias
    return w1, b1, w2, b2


if __name__ == "__main__":
    key = jax.random.PRNGKey(0)
    kx, kp = jax.random.split(key)

    N = 128  # small synthetic batch (mimics the uniform(0, 0.3)/(0.9, 1) data)
    x = jax.random.uniform(kx, (N, 1), jnp.float32, 0.0, 1.0)

    w1, b1, w2, b2 = init_params(kp)

    # jit the whole forward so the wrapper-side reshape/broadcast/slice fuse
    # around the pallas_call instead of being separate tiny HLO copies.
    fwd = jax.jit(mlp_forward)
    out = fwd(x, w1, b1, w2, b2)
    out = jax.block_until_ready(out)

    # Reference check in plain JAX (same math, standard layout)
    h_ref = jnp.maximum(x @ w1.T + b1.T, 0.0)          # (N, H)
    ref = jax.nn.sigmoid(h_ref @ w2 + b2)               # (N, 1)
    assert out.shape == (N, 1)
    assert jnp.allclose(out, ref, atol=1e-5, rtol=1e-5)

    print("KERNEL_OK")
</pallas_src>

<mosaic_0001>
module attributes {stable_mosaic.version = 11 : i64} {
  func.func @mlp_kernel(%arg0: i32, %arg1: memref<1x128xf32, #tpu.memory_space<vmem>>, %arg2: memref<3x56x128xf32, #tpu.memory_space<vmem>>, %arg3: memref<1xf32, #tpu.memory_space<smem>>, %arg4: memref<1x128xf32, #tpu.memory_space<vmem>>) attributes {dimension_semantics = [#tpu.dimension_semantics<parallel>], iteration_bounds = array<i64: 1>, scalar_prefetch = 0 : i64, scratch_operands = 0 : i64, tpu.core_type = #tpu.core_type<tc>, window_params = [{transform_indices = @transform_0, window_bounds = array<i64: 1, 128>}, {pipeline_mode = #tpu.pipeline_mode<synchronous>, transform_indices = @transform_1, window_bounds = array<i64: 3, 56, 128>}, {transform_indices = @transform_2, window_bounds = array<i64: 1>}, {transform_indices = @transform_3, window_bounds = array<i64: 1, 128>}]} {
    %c0 = arith.constant 0 : index
    %c0_0 = arith.constant 0 : index
    %0 = vector.load %arg1[%c0, %c0_0] : memref<1x128xf32, #tpu.memory_space<vmem>>, vector<1x128xf32>
    %c0_1 = arith.constant 0 : index
    %c0_2 = arith.constant 0 : index
    %c0_3 = arith.constant 0 : index
    %1 = vector.load %arg2[%c0_1, %c0_2, %c0_3] : memref<3x56x128xf32, #tpu.memory_space<vmem>>, vector<1x56x128xf32>
    %2 = vector.shape_cast %1 : vector<1x56x128xf32> to vector<56x128xf32>
    %c1 = arith.constant 1 : index
    %c0_4 = arith.constant 0 : index
    %c0_5 = arith.constant 0 : index
    %3 = vector.load %arg2[%c1, %c0_4, %c0_5] : memref<3x56x128xf32, #tpu.memory_space<vmem>>, vector<1x56x128xf32>
    %4 = vector.shape_cast %3 : vector<1x56x128xf32> to vector<56x128xf32>
    %c2 = arith.constant 2 : index
    %c0_6 = arith.constant 0 : index
    %c0_7 = arith.constant 0 : index
    %5 = vector.load %arg2[%c2, %c0_6, %c0_7] : memref<3x56x128xf32, #tpu.memory_space<vmem>>, vector<1x56x128xf32>
    %6 = vector.shape_cast %5 : vector<1x56x128xf32> to vector<56x128xf32>
    %c0_8 = arith.constant 0 : index
    %7 = memref.load %arg3[%c0_8] : memref<1xf32, #tpu.memory_space<smem>>
    %8 = vector.broadcast %0 : vector<1x128xf32> to vector<56x128xf32>
    %9 = arith.mulf %2, %8 : vector<56x128xf32>
    %10 = arith.addf %9, %4 : vector<56x128xf32>
    %cst = arith.constant 0.000000e+00 : f32
    %11 = vector.broadcast %cst : f32 to vector<56x128xf32>
    %12 = arith.maximumf %10, %11 : vector<56x128xf32>
    %13 = arith.mulf %12, %6 : vector<56x128xf32>
    %cst_9 = arith.constant dense<0.000000e+00> : vector<128xf32>
    %14 = vector.multi_reduction <add>, %13, %cst_9 [0] : vector<56x128xf32> to vector<128xf32>
    %15 = vector.shape_cast %14 : vector<128xf32> to vector<1x128xf32>
    %16 = vector.broadcast %7 : f32 to vector<1x128xf32>
    %17 = arith.addf %15, %16 : vector<1x128xf32>
    %18 = arith.negf %17 : vector<1x128xf32>
    %19 = math.exp %18 : vector<1x128xf32>
    %cst_10 = arith.constant 1.000000e+00 : f32
    %20 = vector.broadcast %cst_10 : f32 to vector<1x128xf32>
    %21 = arith.addf %20, %19 : vector<1x128xf32>
    %22 = arith.divf %20, %21 : vector<1x128xf32>
    %c0_11 = arith.constant 0 : index
    %c0_12 = arith.constant 0 : index
    %23 = vector.load %arg4[%c0_11, %c0_12] : memref<1x128xf32, #tpu.memory_space<vmem>>, vector<1x128xf32>
    tpu.vector_store %arg4[%c0_11, %c0_12], %22 {strides = array<i32>} : memref<1x128xf32, #tpu.memory_space<vmem>>, vector<1x128xf32>,
    return
  }
  func.func @transform_0(%arg0: i32) -> (i32, i32) {
    %c0_i32 = arith.constant 0 : i32
    %c0_i32_0 = arith.constant 0 : i32
    return %c0_i32, %arg0 : i32, i32
  }
  func.func @transform_1(%arg0: i32) -> (i32, i32, i32) {
    %c0_i32 = arith.constant 0 : i32
    %c0_i32_0 = arith.constant 0 : i32
    %c0_i32_1 = arith.constant 0 : i32
    %c0_i32_2 = arith.constant 0 : i32
    return %c0_i32, %c0_i32_0, %c0_i32_1 : i32, i32, i32
  }
  func.func @transform_2(%arg0: i32) -> i32 {
    %c0_i32 = arith.constant 0 : i32
    %c0_i32_0 = arith.constant 0 : i32
    return %c0_i32 : i32
  }
  func.func @transform_3(%arg0: i32) -> (i32, i32) {
    %c0_i32 = arith.constant 0 : i32
    %c0_i32_0 = arith.constant 0 : i32
    return %c0_i32, %arg0 : i32, i32
  }
}

</mosaic_0001>

<bundles_post_ra>
// kernel: mlp_forward.1
= control target key start
LH: loop header
LB: loop body
LE: loop exit
PB: predicated region body
PF: predicated region fallthrough
CT: control target
= control target key end

     0   :  { %s262_s0 = inlined_call_operand.vmem [shape: f32[1,128], index: 0, kind: input, shape index: {}]   ;;  %s263_s1 = inlined_call_operand.vmem [shape: f32[3,56,128], index: 1, kind: input, shape index: {}]   ;;  %s264_s2 = inlined_call_operand.<no memory space> [shape: f32[1], index: 2, kind: input, shape index: {}]   ;;  %s265_s3 = inlined_call_operand.hbm [shape: f32[1,128], index: 3, kind: output, shape index: {}]  }
   0x1   :  { %v17_v0 = vld [vmem:[%s263_s1] sm:$0xff]  ;;  %v18_v1 = vld [vmem:[%s263_s1 + $0x8] sm:$0xff]  ;;  %v19_v2 = vld [vmem:[%s263_s1 + $0x10] sm:$0xff] }
   0x2   :  { %v20_v3 = vld [vmem:[%s263_s1 + $0x18] sm:$0xff]  ;;  %v21_v4 = vld [vmem:[%s263_s1 + $0x20] sm:$0xff]  ;;  %v22_v5 = vld [vmem:[%s263_s1 + $0x28] sm:$0xff] }
   0x3   :  { %v23_v6 = vld [vmem:[%s263_s1 + $0x30] sm:$0xff]  ;;  %v122_v7 = vld [vmem:[%s263_s1 + $0x38] sm:$0xff]  ;;  %v138_v8 = vld [vmem:[%s262_s0] ss:$0 sm:$0xff] }
   0x4   :  { %9 = vsyncpa [#allocation4], 0  ;;  %v123_v9 = vld [vmem:[%s263_s1 + $0x40] sm:$0xff]  ;;  %v124_v10 = vld [vmem:[%s263_s1 + $0x48] sm:$0xff]  ;;  %v44_v14 = vmul.f32 %v138_v8, %v17_v0  ;;  %v45_v15 = vmul.f32 %v138_v8, %v18_v1  ;;  %v46_v16 = vmul.f32 %v138_v8, %v19_v2  ;;  %v47_v17 = vmul.f32 %v138_v8, %v20_v3  ;;  %s113_s5 = sshll.u32 %s265_s3, 4  ;;  %s114_s5 = int_to_ptr.hbm [resolvable:$true] %s113_s5 }
   0x5   :  { %v125_v11 = vld [vmem:[%s263_s1 + $0x50] sm:$0xff]  ;;  %v126_v12 = vld [vmem:[%s263_s1 + $0x58] sm:$0xff]  ;;  %v127_v13 = vld [vmem:[%s263_s1 + $0x60] sm:$0xff]  ;;  %v48_v18 = vmul.f32 %v138_v8, %v21_v4  ;;  %v49_v19 = vmul.f32 %v138_v8, %v22_v5  ;;  %v50_v20 = vmul.f32 %v138_v8, %v23_v6  ;;  %v84_v61 = vstv %s264_s2 }
   0x6   :  { %v128_v21 = vld [vmem:[%s263_s1 + $0x68] sm:$0xff]  ;;  %v51_v22 = vadd.f32 %v122_v7, %v44_v14  ;;  %v52_v23 = vadd.f32 %v123_v9, %v45_v15  ;;  %v53_v24 = vadd.f32 %v124_v10, %v46_v16  ;;  %v54_v25 = vadd.f32 %v125_v11, %v47_v17  ;;  %v129_v26 = vld [vmem:[%s263_s1 + $0x70] sm:$0xff]  ;;  %v130_v27 = vld [vmem:[%s263_s1 + $0x78] sm:$0xff] }
   0x7   :  { %v131_v28 = vld [vmem:[%s263_s1 + $0x80] sm:$0xff]  ;;  %v55_v29 = vadd.f32 %v126_v12, %v48_v18  ;;  %v56_v30 = vadd.f32 %v127_v13, %v49_v19  ;;  %v132_v35 = vld [vmem:[%s263_s1 + $0x88] sm:$0xff]  ;;  %v57_v36 = vadd.f32 %v128_v21, %v50_v20  ;;  %v133_v41 = vld [vmem:[%s263_s1 + $0x90] sm:$0xff] }
   0x8   :  { %v58_v31 = vmax.f32 %v51_v22, 0.0  ;;  %v59_v32 = vmax.f32 %v52_v23, 0.0  ;;  %v60_v33 = vmax.f32 %v53_v24, 0.0  ;;  %v61_v34 = vmax.f32 %v54_v25, 0.0  ;;  %v134_v45 = vld [vmem:[%s263_s1 + $0x98] sm:$0xff]  ;;  %v135_v49 = vld [vmem:[%s263_s1 + $0xa0] sm:$0xff] }
   0x9   :  { %v62_v37 = vmax.f32 %v55_v29, 0.0  ;;  %v63_v42 = vmax.f32 %v56_v30, 0.0  ;;  %v64_v46 = vmax.f32 %v57_v36, 0.0  ;;  %s169_s1 = smov [#allocation3]  }
   0xa   :  { %v65_v38 = vmul.f32 %v129_v26, %v58_v31  ;;  %v66_v39 = vmul.f32 %v130_v27, %v59_v32  ;;  %v67_v40 = vmul.f32 %v131_v28, %v60_v33  ;;  %v68_v43 = vmul.f32 %v132_v35, %v61_v34  ;;  %s111_s30 = sshll.u32 %s169_s1, 4  ;;  %s112_s30 = int_to_ptr.vmem [resolvable:$true] %s111_s30 }
   0xb   :  { %v69_v47 = vmul.f32 %v133_v41, %v62_v37  ;;  %v70_v50 = vmul.f32 %v134_v45, %v63_v42  ;;  %v71_v52 = vmul.f32 %v135_v49, %v64_v46 }
   0xc   :  { %v72_v44 = vadd.f32 %v66_v39, %v65_v38 }
   0xe   :  { %v73_v48 = vadd.f32 %v72_v44, %v67_v40 }
  0x10   :  { %v74_v51 = vadd.f32 %v73_v48, %v68_v43 }
  0x12   :  { %v75_v53 = vadd.f32 %v74_v51, %v69_v47 }
  0x14   :  { %v76_v54 = vadd.f32 %v75_v53, %v70_v50 }
  0x16   :  { %v77_v55 = vadd.f32 %v76_v54, %v71_v52 }
  0x18   :  { %v78_v56 = vrot.slane %v77_v55, 4 }
  0x1a   :  { %v79_v57 = vadd.f32 %v78_v56, %v77_v55 }
  0x1c   :  { %v80_v58 = vrot.slane %v79_v57, 2 }
  0x1e   :  { %v81_v59 = vadd.f32 %v80_v58, %v79_v57 }
  0x20   :  { %v82_v60 = vrot.slane %v81_v59, 1 }
  0x22   :  { %v83_v62 = vadd.f32 %v82_v60, %v81_v59 }
  0x24   :  { %v85_v63 = vadd.f32 %v84_v61, %v83_v62 }
  0x26   :  { %v136_v0 = vmul.f32 -1.442695, %v85_v63 }
  0x28   :  { %139 = vpow2.f32 %v136_v0 }
  0x2e   :  { %v140_v1 = vpop.eup %139 }
  0x2f   :  { %v89_v2 = vadd.f32 1.0, %v140_v1 }
  0x31   :  { %141 = vrcp.f32 %v89_v2  ;;  %v101_v5 = vand.u32 2147483648, %v89_v2  ;;  %vm95_vm0 = vweird.f32 %v89_v2  ;;  %v99_v7 = vand.u32 2147483647, %v89_v2 }
  0x33   :  { %v102_v9 = vor.u32 1.1754944e-38, %v101_v5  ;;  %vm100_vm3 = vcmp.eq.f32.partialorder %v99_v7, 8.507059e+37 }
  0x37   :  { %v142_v3 = vpop.eup %141 }
  0x38   :  { %v91_v4 = vmul.f32 %v142_v3, %v89_v2  ;;  %vm96_vm1 = vweird.f32 %v142_v3 }
  0x39   :  { %vm97_vm2 = vmor %vm95_vm0, %vm96_vm1 }
  0x3a   :  { %v92_v6 = vsub.f32 1.0, %v91_v4 }
  0x3c   :  { %v93_v8 = vmul.f32 %v142_v3, %v92_v6 }
  0x3e   :  { %v94_v10 = vadd.f32 %v142_v3, %v93_v8 }
  0x40   :  { %v98_v11 = vsel %vm97_vm2, %v142_v3, %v94_v10 }
  0x41   :  { %v103_v12 = vsel %vm100_vm3, %v102_v9, %v98_v11 }
  0x42   :  { %105 = vst [vmem:[#allocation3] sm:$0x1] %v103_v12 }
  0x43   :  { %116 = dma.vmem_to_hbm [thread:$0]  %s112_s30, 16, %s114_s5, [#allocation4]  }
  0x44   :  { %167 = dma.done.wait [#allocation4], 16  }
  0x45   :  { %168 = vsyncadd [#allocation4], 4294967280 }
  0x46   :  { %121 = vsyncpa [#allocation4], 1 }

</bundles_post_ra>
